<compile_context>
chip_gen: v7x
topology: tpu7x:2x2x1
jax: 0.10.0
libtpu: 0.0.40
codegen_flags: <defaults>
</compile_context>

<pallas_src>
import math

import jax
import jax.numpy as jnp
from jax.experimental import pallas as pl
from jax.experimental.pallas import tpu as pltpu


def _roundup(a, b):
    return ((a + b - 1) // b) * b


# ----------------------------------------------------------------------------
# Fused Pallas kernel: conv1x1+ReLU -> (folded) 3x3 conv+ReLU -> conv1x1
#                      -> residual add -> ReLU, all on one VMEM row tile.
# ----------------------------------------------------------------------------
def _fused_kernel(x_ref, w1_ref, b1_ref, w2_ref, b2_ref, w3_ref, b3_ref, o_ref):
    f32 = jnp.float32
    x = x_ref[...]                                   # (TM, P): NCHW-flat lanes (c,h), zero-padded past 3C

    # --- Conv2d 1x1 + ReLU ---------------------------------------------------
    # w1 packed block-diagonally over the 3 h-positions, permuting lanes to (h,c).
    h1 = jnp.dot(x, w1_ref[...], preferred_element_type=f32) + b1_ref[...]
    h1 = jnp.maximum(h1, 0.0)                        # (TM, P), lanes (h, c)

    # --- ReplicationPad2d((1,0)) + Conv2d 3x3 (circular W pad) + ReLU ---------
    # With W == 1 every kw tap of every output column reads the SAME column,
    # so sum_kw(h1 @ W2[kw]) == h1 @ sum_kw(W2[kw]); the kw sum was folded into
    # the packed weight on the host -> ONE matmul.
    h2 = jnp.dot(h1, w2_ref[...], preferred_element_type=f32) + b2_ref[...]
    h2 = jnp.maximum(h2, 0.0)                        # (TM, Cp)

    # --- Conv2d 1x1 (no activation) -------------------------------------------
    # w3 packed to emit NCHW-flat (c, h) lanes (each output channel repeated
    # across the 3 h-positions == the PyTorch broadcast of the residual add).
    h3 = jnp.dot(h2, w3_ref[...], preferred_element_type=f32) + b3_ref[...]  # (TM, P)

    # --- residual add + final ReLU (padded lanes stay exactly zero) ----------
    o_ref[...] = jnp.maximum(x + h3, 0.0).astype(o_ref.dtype)


# ----------------------------------------------------------------------------
# One-time parameter packing (hoisted out of the per-call path).
# ----------------------------------------------------------------------------
def prepare_params(raw_params, dtype=jnp.float32):
    """Pack PyTorch-layout conv weights into lane-dense (128-multiple) matrices."""
    w1, b1, w2, b2, w3, b3 = raw_params
    C = w1.shape[0]
    H = 3                      # only height for which the residual add broadcasts
    L = H * C                  # NCHW-flat lane count
    P = _roundup(L, 128)       # padded residual/lane width
    Cp = _roundup(C, 128)      # padded hidden width

    w1_t = jnp.transpose(w1[:, :, 0, 0]).astype(dtype)            # (C_in, C_out)
    w3_t = jnp.transpose(w3[:, :, 0, 0]).astype(dtype)            # (C_in, C_out)

    # conv1: w1_blk[c_in*3 + h_in, h_out*C + c_out] = (h_in==h_out) * w1_t[c_in, c_out]
    eye_h = jnp.eye(H, dtype=dtype)
    w1_blk = (w1_t[:, None, None, :] * eye_h[None, :, :, None]).reshape(L, L)
    b1_r = jnp.tile(b1.astype(dtype), H)                          # lane h*C + c -> b1[c]

    # conv2: fold the 3 kw taps (exact for W==1). Rows (kh, c_in) match h1 lanes.
    #   w2_sum[kh*C + c_in, c_out] = sum_kw w2[c_out, c_in, kh, kw]
    w2_sum = jnp.transpose(w2.sum(axis=3), (2, 1, 0)).reshape(L, C).astype(dtype)
    b2_r = b2.astype(dtype)

    # conv3: w3_rep[c_in, c_out*3 + h] = w3_t[c_in, c_out]  (NCHW-flat output lanes)
    w3_rep = jnp.repeat(w3_t, H, axis=1)                          # (C, 3*C)
    b3_r = jnp.repeat(b3.astype(dtype), H)

    # Zero-pad every lane dimension up to a multiple of 128 (lane-dense MXU /
    # unmasked stores); padded lanes carry exact zeros through the whole chain.
    w1_p = jnp.zeros((P, P), dtype).at[:L, :L].set(w1_blk)
    b1_p = jnp.zeros((1, P), dtype).at[0, :L].set(b1_r)
    w2_p = jnp.zeros((P, Cp), dtype).at[:L, :C].set(w2_sum)
    b2_p = jnp.zeros((1, Cp), dtype).at[0, :C].set(b2_r)
    w3_p = jnp.zeros((Cp, P), dtype).at[:C, :L].set(w3_rep)
    b3_p = jnp.zeros((1, P), dtype).at[0, :L].set(b3_r)
    return (w1_p, b1_p, w2_p, b2_p, w3_p, b3_p)


# ----------------------------------------------------------------------------
# Forward pass wrapper: reshape/pad -> row-tiled pallas_call -> slice/broadcast.
# ----------------------------------------------------------------------------
def res_identity_critic_forward(x, packed_params):
    """x: (N, C, 3, 1) NCHW float32 -> (N, C, 3, 2) NCHW float32."""
    N, C, H, W = x.shape
    if (H, W) != (3, 1):
        raise ValueError(
            "ResIdentityCritic's residual add only broadcasts for spatial shape "
            f"(H, W) == (3, 1); got {(H, W)}."
        )
    w1_p, b1_p, w2_p, b2_p, w3_p, b3_p = packed_params
    P = w1_p.shape[0]
    Cp = w2_p.shape[1]
    L = C * H

    x_flat = x.reshape(N, L)                        # NCHW-flat (pure reshape)

    # Row tile: sublane-aligned, up to 512 rows per grid step (pipeline sweet
    # spot); batch padded up to a whole number of tiles.
    TM = min(512, _roundup(N, 8))
    Np = _roundup(N, TM)
    x_pad = jnp.pad(x_flat, ((0, Np - N), (0, P - L)))

    out_pad = pl.pallas_call(
        _fused_kernel,
        out_shape=jax.ShapeDtypeStruct((Np, P), x.dtype),
        grid=(Np // TM,),
        in_specs=[
            pl.BlockSpec((TM, P), lambda i: (i, 0)),     # x rows: tiled over grid
            pl.BlockSpec((P, P), lambda i: (0, 0)),      # w1 (VMEM-resident)
            pl.BlockSpec((1, P), lambda i: (0, 0)),      # b1
            pl.BlockSpec((P, Cp), lambda i: (0, 0)),     # w2 (kw-folded)
            pl.BlockSpec((1, Cp), lambda i: (0, 0)),     # b2
            pl.BlockSpec((Cp, P), lambda i: (0, 0)),     # w3
            pl.BlockSpec((1, P), lambda i: (0, 0)),      # b3
        ],
        out_specs=pl.BlockSpec((TM, P), lambda i: (i, 0)),
        compiler_params=pltpu.CompilerParams(
            dimension_semantics=("parallel",),           # shards rows across TCs on v7x
            vmem_limit_bytes=32 * 1024 * 1024,           # explicit; fits v5e/v6e/v7x
        ),
    )(x_pad, w1_p, b1_p, w2_p, b2_p, w3_p, b3_p)

    out_flat = out_pad[:N, :L]
    # seq(x) has two identical W columns (W==1 + replication/circular padding),
    # so the broadcasted final output just duplicates the W dimension.
    return jnp.broadcast_to(out_flat.reshape(N, C, H, 1), (N, C, H, 2))


# ----------------------------------------------------------------------------
# Deterministic parameter init (PyTorch Conv2d default-style uniform bounds)
# ----------------------------------------------------------------------------
def init_params(key, features):
    ks = jax.random.split(key, 6)

    def conv_init(kw_key, kb_key, c_out, c_in, kh, kw):
        bound = 1.0 / math.sqrt(c_in * kh * kw)
        w = jax.random.uniform(kw_key, (c_out, c_in, kh, kw), jnp.float32, -bound, bound)
        b = jax.random.uniform(kb_key, (c_out,), jnp.float32, -bound, bound)
        return w, b

    w1, b1 = conv_init(ks[0], ks[1], features, features, 1, 1)
    w2, b2 = conv_init(ks[2], ks[3], features, features, 3, 3)
    w3, b3 = conv_init(ks[4], ks[5], features, features, 1, 1)
    return (w1, b1, w2, b2, w3, b3)


# ----------------------------------------------------------------------------
# Pure-JAX reference (NCHW, full 9-tap conv) mirroring the PyTorch module.
# ----------------------------------------------------------------------------
def torch_ref(x, params):
    w1, b1, w2, b2, w3, b3 = params
    h = jnp.einsum("oi,nihw->nohw", w1[:, :, 0, 0], x) + b1[None, :, None, None]
    h = jnp.maximum(h, 0.0)
    h = jnp.concatenate([h[..., :1], h], axis=-1)                 # ReplicationPad2d((1,0))
    hp = jnp.concatenate([h[..., -1:], h, h[..., :1]], axis=-1)   # circular pad W by 1
    H2, W2 = h.shape[2] - 2, h.shape[3]
    out = jnp.zeros((x.shape[0], w2.shape[0], H2, W2), x.dtype)
    for kh in range(3):
        for kw in range(3):
            out = out + jnp.einsum(
                "oi,nihw->nohw", w2[:, :, kh, kw], hp[:, :, kh:kh + H2, kw:kw + W2]
            )
    out = jnp.maximum(out + b2[None, :, None, None], 0.0)
    out = jnp.einsum("oi,nihw->nohw", w3[:, :, 0, 0], out) + b3[None, :, None, None]
    return jnp.maximum(out + x, 0.0)


if __name__ == "__main__":
    key = jax.random.PRNGKey(0)
    kx, kp, kb = jax.random.split(key, 3)

    features = 32
    raw_params = init_params(kp, features)
    packed = prepare_params(raw_params)          # one-time weight pre-packing

    fwd = jax.jit(res_identity_critic_forward)

    # Small shape (N, C, H, W) = (2, 32, 3, 1): the only spatial shape family
    # for which the module's residual add broadcasts in PyTorch.
    x_small = jax.random.normal(kx, (2, features, 3, 1), jnp.float32)
    out_small = jax.block_until_ready(fwd(x_small, packed))
    ref_small = torch_ref(x_small, raw_params)
    assert out_small.shape == ref_small.shape == (2, features, 3, 2), (out_small.shape,)
    assert jnp.allclose(out_small, ref_small, rtol=1e-4, atol=1e-4), float(
        jnp.max(jnp.abs(out_small - ref_small))
    )

    # Batched shape: exercises the row-tiled "parallel" grid (TM=512, 2 steps).
    x_big = jax.random.normal(kb, (1024, features, 3, 1), jnp.float32)
    out_big = jax.block_until_ready(fwd(x_big, packed))
    ref_big = torch_ref(x_big, raw_params)
    assert out_big.shape == ref_big.shape == (1024, features, 3, 2), (out_big.shape,)
    assert jnp.allclose(out_big, ref_big, rtol=1e-4, atol=1e-4), float(
        jnp.max(jnp.abs(out_big - ref_big))
    )

    print("KERNEL_OK")
</pallas_src>

<mosaic_0001>
module attributes {stable_mosaic.version = 11 : i64} {
  func.func @_fused_kernel(%arg0: i32, %arg1: memref<8x128xf32, #tpu.memory_space<vmem>>, %arg2: memref<128x128xf32, #tpu.memory_space<vmem>>, %arg3: memref<1x128xf32, #tpu.memory_space<vmem>>, %arg4: memref<128x128xf32, #tpu.memory_space<vmem>>, %arg5: memref<1x128xf32, #tpu.memory_space<vmem>>, %arg6: memref<128x128xf32, #tpu.memory_space<vmem>>, %arg7: memref<1x128xf32, #tpu.memory_space<vmem>>, %arg8: memref<8x128xf32, #tpu.memory_space<vmem>>) attributes {dimension_semantics = [#tpu.dimension_semantics<parallel>], iteration_bounds = array<i64: 1>, scalar_prefetch = 0 : i64, scratch_operands = 0 : i64, tpu.core_type = #tpu.core_type<tc>, window_params = [{transform_indices = @transform_0, window_bounds = array<i64: 8, 128>}, {pipeline_mode = #tpu.pipeline_mode<synchronous>, transform_indices = @transform_1, window_bounds = array<i64: 128, 128>}, {pipeline_mode = #tpu.pipeline_mode<synchronous>, transform_indices = @transform_2, window_bounds = array<i64: 1, 128>}, {pipeline_mode = #tpu.pipeline_mode<synchronous>, transform_indices = @transform_3, window_bounds = array<i64: 128, 128>}, {pipeline_mode = #tpu.pipeline_mode<synchronous>, transform_indices = @transform_4, window_bounds = array<i64: 1, 128>}, {pipeline_mode = #tpu.pipeline_mode<synchronous>, transform_indices = @transform_5, window_bounds = array<i64: 128, 128>}, {pipeline_mode = #tpu.pipeline_mode<synchronous>, transform_indices = @transform_6, window_bounds = array<i64: 1, 128>}, {transform_indices = @transform_7, window_bounds = array<i64: 8, 128>}]} {
    %c0 = arith.constant 0 : index
    %c0_0 = arith.constant 0 : index
    %0 = vector.load %arg1[%c0, %c0_0] : memref<8x128xf32, #tpu.memory_space<vmem>>, vector<8x128xf32>
    %c0_1 = arith.constant 0 : index
    %c0_2 = arith.constant 0 : index
    %1 = vector.load %arg2[%c0_1, %c0_2] : memref<128x128xf32, #tpu.memory_space<vmem>>, vector<128x128xf32>
    %cst = arith.constant dense<0.000000e+00> : vector<8x128xf32>
    %2 = tpu.matmul %0, %1, %cst {dimension_numbers = #tpu.dot_dimension_numbers<[1], [0], [0], [1], [0, 0, 1, 1], [], []>} : vector<8x128xf32>, vector<128x128xf32>, vector<8x128xf32> -> vector<8x128xf32>
    %c0_3 = arith.constant 0 : index
    %c0_4 = arith.constant 0 : index
    %3 = vector.load %arg3[%c0_3, %c0_4] : memref<1x128xf32, #tpu.memory_space<vmem>>, vector<1x128xf32>
    %4 = vector.broadcast %3 : vector<1x128xf32> to vector<8x128xf32>
    %5 = arith.addf %2, %4 : vector<8x128xf32>
    %cst_5 = arith.constant 0.000000e+00 : f32
    %6 = vector.broadcast %cst_5 : f32 to vector<8x128xf32>
    %7 = arith.maximumf %5, %6 : vector<8x128xf32>
    %c0_6 = arith.constant 0 : index
    %c0_7 = arith.constant 0 : index
    %8 = vector.load %arg4[%c0_6, %c0_7] : memref<128x128xf32, #tpu.memory_space<vmem>>, vector<128x128xf32>
    %cst_8 = arith.constant dense<0.000000e+00> : vector<8x128xf32>
    %9 = tpu.matmul %7, %8, %cst_8 {dimension_numbers = #tpu.dot_dimension_numbers<[1], [0], [0], [1], [0, 0, 1, 1], [], []>} : vector<8x128xf32>, vector<128x128xf32>, vector<8x128xf32> -> vector<8x128xf32>
    %c0_9 = arith.constant 0 : index
    %c0_10 = arith.constant 0 : index
    %10 = vector.load %arg5[%c0_9, %c0_10] : memref<1x128xf32, #tpu.memory_space<vmem>>, vector<1x128xf32>
    %11 = vector.broadcast %10 : vector<1x128xf32> to vector<8x128xf32>
    %12 = arith.addf %9, %11 : vector<8x128xf32>
    %cst_11 = arith.constant 0.000000e+00 : f32
    %13 = vector.broadcast %cst_11 : f32 to vector<8x128xf32>
    %14 = arith.maximumf %12, %13 : vector<8x128xf32>
    %c0_12 = arith.constant 0 : index
    %c0_13 = arith.constant 0 : index
    %15 = vector.load %arg6[%c0_12, %c0_13] : memref<128x128xf32, #tpu.memory_space<vmem>>, vector<128x128xf32>
    %cst_14 = arith.constant dense<0.000000e+00> : vector<8x128xf32>
    %16 = tpu.matmul %14, %15, %cst_14 {dimension_numbers = #tpu.dot_dimension_numbers<[1], [0], [0], [1], [0, 0, 1, 1], [], []>} : vector<8x128xf32>, vector<128x128xf32>, vector<8x128xf32> -> vector<8x128xf32>
    %c0_15 = arith.constant 0 : index
    %c0_16 = arith.constant 0 : index
    %17 = vector.load %arg7[%c0_15, %c0_16] : memref<1x128xf32, #tpu.memory_space<vmem>>, vector<1x128xf32>
    %18 = vector.broadcast %17 : vector<1x128xf32> to vector<8x128xf32>
    %19 = arith.addf %16, %18 : vector<8x128xf32>
    %20 = arith.addf %0, %19 : vector<8x128xf32>
    %cst_17 = arith.constant 0.000000e+00 : f32
    %21 = vector.broadcast %cst_17 : f32 to vector<8x128xf32>
    %22 = arith.maximumf %20, %21 : vector<8x128xf32>
    %c0_18 = arith.constant 0 : index
    %c0_19 = arith.constant 0 : index
    %23 = vector.load %arg8[%c0_18, %c0_19] : memref<8x128xf32, #tpu.memory_space<vmem>>, vector<8x128xf32>
    tpu.vector_store %arg8[%c0_18, %c0_19], %22 {strides = array<i32>} : memref<8x128xf32, #tpu.memory_space<vmem>>, vector<8x128xf32>,
    return
  }
  func.func @transform_0(%arg0: i32) -> (i32, i32) {
    %c0_i32 = arith.constant 0 : i32
    %c0_i32_0 = arith.constant 0 : i32
    return %arg0, %c0_i32 : i32, i32
  }
  func.func @transform_1(%arg0: i32) -> (i32, i32) {
    %c0_i32 = arith.constant 0 : i32
    %c0_i32_0 = arith.constant 0 : i32
    %c0_i32_1 = arith.constant 0 : i32
    return %c0_i32, %c0_i32_0 : i32, i32
  }
  func.func @transform_2(%arg0: i32) -> (i32, i32) {
    %c0_i32 = arith.constant 0 : i32
    %c0_i32_0 = arith.constant 0 : i32
    %c0_i32_1 = arith.constant 0 : i32
    return %c0_i32, %c0_i32_0 : i32, i32
  }
  func.func @transform_3(%arg0: i32) -> (i32, i32) {
    %c0_i32 = arith.constant 0 : i32
    %c0_i32_0 = arith.constant 0 : i32
    %c0_i32_1 = arith.constant 0 : i32
    return %c0_i32, %c0_i32_0 : i32, i32
  }
  func.func @transform_4(%arg0: i32) -> (i32, i32) {
    %c0_i32 = arith.constant 0 : i32
    %c0_i32_0 = arith.constant 0 : i32
    %c0_i32_1 = arith.constant 0 : i32
    return %c0_i32, %c0_i32_0 : i32, i32
  }
  func.func @transform_5(%arg0: i32) -> (i32, i32) {
    %c0_i32 = arith.constant 0 : i32
    %c0_i32_0 = arith.constant 0 : i32
    %c0_i32_1 = arith.constant 0 : i32
    return %c0_i32, %c0_i32_0 : i32, i32
  }
  func.func @transform_6(%arg0: i32) -> (i32, i32) {
    %c0_i32 = arith.constant 0 : i32
    %c0_i32_0 = arith.constant 0 : i32
    %c0_i32_1 = arith.constant 0 : i32
    return %c0_i32, %c0_i32_0 : i32, i32
  }
  func.func @transform_7(%arg0: i32) -> (i32, i32) {
    %c0_i32 = arith.constant 0 : i32
    %c0_i32_0 = arith.constant 0 : i32
    return %arg0, %c0_i32 : i32, i32
  }
}

</mosaic_0001>

<bundles_post_ra>
// kernel: res_identity_critic_forward.1
= control target key start
LH: loop header
LB: loop body
LE: loop exit
PB: predicated region body
PF: predicated region fallthrough
CT: control target
= control target key end

     0   :  { %12 = vsyncpa [#allocation3], 0  ;;  %s799_s0 = inlined_call_operand.vmem [shape: f32[8,128], index: 0, kind: input, shape index: {}]   ;;  %s800_s1 = inlined_call_operand.vmem [shape: f32[128,128], index: 1, kind: input, shape index: {}]   ;;  %s801_s2 = inlined_call_operand.vmem [shape: f32[1,128], index: 2, kind: input, shape index: {}]   ;;  %s802_s3 = inlined_call_operand.hbm [shape: f32[128,128], index: 3, kind: input, shape index: {}]   ;;  %s803_s4 = inlined_call_operand.vmem [shape: f32[1,128], index: 4, kind: input, shape index: {}]   ;;  %s804_s5 = inlined_call_operand.hbm [shape: f32[128,128], index: 5, kind: input, shape index: {}]   ;;  %s805_s6 = inlined_call_operand.vmem [shape: f32[1,128], index: 6, kind: input, shape index: {}]   ;;  %s806_s7 = inlined_call_operand.vmem [shape: f32[8,128], index: 7, kind: output, shape index: {}]  }
   0x1   :  { %13 = vsyncpa [#allocation5], 0  ;;  %s631_s24 = smov [#allocation2]   ;;  %s583_s28 = scalar_lea.hbm %s802_s3, 2048 }
   0x2   :  { %s25_s25 = sshll.u32 %s631_s24, 4  ;;  %p584_p0 = scmp.ne.s32.totalorder %s802_s3, %s583_s28  ;;  %s26_s25 = int_to_ptr.vmem [resolvable:$true] %s25_s25 }
   0x3   :  { %p587_p1 = scmp.lt.u32.totalorder %s583_s28, %s802_s3 }
   0x5   :  { %p589_p2 = pnand %p587_p1, %p584_p0 }
   0x7   :  { %592 = shalt.err (!%p589_p2)
}
   0x8   :  { %s593_s10 = scalar_lea.vmem %s26_s25, 2048  ;;  %p598_p4 = scmp.lt.s32.totalorder %s26_s25, %s26_s25 }
   0x9   :  { %p594_p3 = scmp.ne.s32.totalorder %s26_s25, %s593_s10  ;;  %p599_p5 = scmp.lt.s32.totalorder %s593_s10, %s593_s10 }
   0xb   :  { %p600_p6 = por %p599_p5, %p598_p4 }
   0xd   :  { %p601_p7 = pnand %p600_p6, %p594_p3 }
   0xf   :  { %604 = shalt.err (!%p601_p7)
}
  0x10   :  { %s632_s11 = smov 128   ;;  %s633_s12 = smov 8  }
  0x11   :  { %31 = dma.hbm_to_vmem [thread:$0]  %s802_s3, 2048, %s26_s25, [#allocation3], %s632_s11, %s632_s11, %s633_s12  }
  0x12   :  { %s634_s15 = smov [#allocation4]   ;;  %s605_s19 = scalar_lea.hbm %s804_s5, 2048 }
  0x13   :  { %s39_s16 = sshll.u32 %s634_s15, 4  ;;  %p606_p8 = scmp.ne.s32.totalorder %s804_s5, %s605_s19  ;;  %s40_s16 = int_to_ptr.vmem [resolvable:$true] %s39_s16 }
  0x14   :  { %p609_p9 = scmp.lt.u32.totalorder %s605_s19, %s804_s5 }
  0x16   :  { %p611_p10 = pnand %p609_p9, %p606_p8 }
  0x18   :  { %614 = shalt.err (!%p611_p10)
}
  0x19   :  { %s615_s24 = scalar_lea.vmem %s40_s16, 2048  ;;  %p620_p12 = scmp.lt.s32.totalorder %s40_s16, %s40_s16 }
  0x1a   :  { %p616_p11 = scmp.ne.s32.totalorder %s40_s16, %s615_s24  ;;  %p621_p13 = scmp.lt.s32.totalorder %s615_s24, %s615_s24 }
  0x1c   :  { %p622_p0 = por %p621_p13, %p620_p12 }
  0x1e   :  { %p623_p1 = pnand %p622_p0, %p616_p11 }
  0x20   :  { %626 = shalt.err (!%p623_p1)
}
  0x21   :  { %45 = dma.hbm_to_vmem [thread:$0]  %s804_s5, 2048, %s40_s16, [#allocation5], %s632_s11, %s632_s11, %s633_s12  }
  0x22   :  { %627 = dma.done.wait [#allocation3], 2048  }
  0x23   :  { %628 = vsyncadd [#allocation3], 4294965248 }
  0x24   :  { %629 = dma.done.wait [#allocation5], 2048  }
  0x25   :  { %630 = vsyncadd [#allocation5], 4294965248  ;;  %v635_v0 = vmov 0.0|0.0   ;;  %vm636_vm0 = vmmov 0   ;;  %v637_v1 = vmov 0.0   ;;  %v55_v2 = vld [vmem:[%s800_s1] sm:$0xff] }
  0x26   :  { %504 = vmatprep.subr.bf16.mxu0 %v635_v0  ;;  %431 = vmatprep.mubr.msk.f32.mxu0 %vm636_vm0, %v637_v1  ;;  %v56_v3 = vld [vmem:[%s800_s1 + $0x8] sm:$0xff]  ;;  %v57_v4 = vld [vmem:[%s800_s1 + $0x10] sm:$0xff]  ;;  %v58_v6 = vld [vmem:[%s800_s1 + $0x18] sm:$0xff] }
  0x27   :  { %528 = vmatprep.subr.bf16.mxu1 %v635_v0  ;;  %466 = vmatprep.mubr.msk.f32.mxu1 %vm636_vm0, %v637_v1  ;;  %v505_v5 = vpack.c.bf16 %v56_v3, %v55_v2  ;;  %v508_v7 = vpack.c.bf16 %v58_v6, %v57_v4  ;;  %v59_v8 = vld [vmem:[%s800_s1 + $0x20] sm:$0xff]  ;;  %v60_v9 = vld [vmem:[%s800_s1 + $0x28] sm:$0xff]  ;;  %v151_v12 = vld [vmem:[#allocation2 + $0x10] sm:$0xff] }
  0x28   :  { %v149_v10 = vld [vmem:[#allocation2] sm:$0xff]  ;;  %v150_v11 = vld [vmem:[#allocation2 + $0x8] sm:$0xff]  ;;  %v152_v13 = vld [vmem:[#allocation2 + $0x18] sm:$0xff]  ;;  %v511_v14 = vpack.c.bf16 %v60_v9, %v59_v8 }
  0x29   :  { %506 = vmatpush3.bf16.msra.mxu0 %v505_v5  ;;  %v529_v15 = vpack.c.bf16 %v150_v11, %v149_v10  ;;  %v61_v16 = vld [vmem:[%s800_s1 + $0x30] sm:$0xff]  ;;  %v62_v17 = vld [vmem:[%s800_s1 + $0x38] sm:$0xff]  ;;  %v532_v18 = vpack.c.bf16 %v152_v13, %v151_v12  ;;  %v153_v19 = vld [vmem:[#allocation2 + $0x20] sm:$0xff] }
  0x2a   :  { %507 = vmatprep.subr.bf16.mxu0 %v635_v0  ;;  %v154_v20 = vld [vmem:[#allocation2 + $0x28] sm:$0xff]  ;;  %v514_v21 = vpack.c.bf16 %v62_v17, %v61_v16  ;;  %v63_v22 = vld [vmem:[%s800_s1 + $0x40] sm:$0xff]  ;;  %v155_v25 = vld [vmem:[#allocation2 + $0x30] sm:$0xff] }
  0x2b   :  { %530 = vmatpush3.bf16.msra.mxu1 %v529_v15  ;;  %v64_v23 = vld [vmem:[%s800_s1 + $0x48] sm:$0xff]  ;;  %v535_v24 = vpack.c.bf16 %v154_v20, %v153_v19  ;;  %v156_v26 = vld [vmem:[#allocation2 + $0x38] sm:$0xff]  ;;  %v65_v28 = vld [vmem:[%s800_s1 + $0x50] sm:$0xff] }
  0x2c   :  { %531 = vmatprep.subr.bf16.mxu1 %v635_v0  ;;  %v517_v27 = vpack.c.bf16 %v64_v23, %v63_v22  ;;  %v66_v29 = vld [vmem:[%s800_s1 + $0x58] sm:$0xff]  ;;  %v538_v30 = vpack.c.bf16 %v156_v26, %v155_v25  ;;  %v157_v31 = vld [vmem:[#allocation2 + $0x40] sm:$0xff]  ;;  %v158_v32 = vld [vmem:[#allocation2 + $0x48] sm:$0xff] }
  0x2d   :  { %509 = vmatpush3.bf16.msra.mxu0 %v508_v7  ;;  %v520_v33 = vpack.c.bf16 %v66_v29, %v65_v28  ;;  %v67_v34 = vld [vmem:[%s800_s1 + $0x60] sm:$0xff]  ;;  %v68_v35 = vld [vmem:[%s800_s1 + $0x68] sm:$0xff]  ;;  %v541_v36 = vpack.c.bf16 %v158_v32, %v157_v31  ;;  %v159_v37 = vld [vmem:[#allocation2 + $0x50] sm:$0xff] }
  0x2e   :  { %510 = vmatprep.subr.bf16.mxu0 %v635_v0  ;;  %v160_v38 = vld [vmem:[#allocation2 + $0x58] sm:$0xff]  ;;  %v523_v39 = vpack.c.bf16 %v68_v35, %v67_v34  ;;  %v69_v40 = vld [vmem:[%s800_s1 + $0x70] sm:$0xff]  ;;  %v161_v43 = vld [vmem:[#allocation2 + $0x60] sm:$0xff] }
  0x2f   :  { %533 = vmatpush3.bf16.msra.mxu1 %v532_v18  ;;  %v70_v41 = vld [vmem:[%s800_s1 + $0x78] sm:$0xff]  ;;  %v544_v42 = vpack.c.bf16 %v160_v38, %v159_v37  ;;  %v162_v44 = vld [vmem:[#allocation2 + $0x68] sm:$0xff]  ;;  %v772_v47 = vld [vmem:[%s799_s0] sm:$0xff] }
  0x30   :  { %534 = vmatprep.subr.bf16.mxu1 %v635_v0  ;;  %v526_v45 = vpack.c.bf16 %v70_v41, %v69_v40  ;;  %v547_v46 = vpack.c.bf16 %v162_v44, %v161_v43  ;;  %v163_v48 = vld [vmem:[#allocation2 + $0x70] sm:$0xff]  ;;  %v164_v49 = vld [vmem:[#allocation2 + $0x78] sm:$0xff]  ;;  %v243_v51 = vld [vmem:[#allocation4] sm:$0xff] }
  0x31   :  { %512 = vmatpush3.bf16.msra.mxu0 %v511_v14  ;;  %v550_v50 = vpack.c.bf16 %v164_v49, %v163_v48  ;;  %v244_v52 = vld [vmem:[#allocation4 + $0x8] sm:$0xff]  ;;  %v245_v53 = vld [vmem:[#allocation4 + $0x10] sm:$0xff]  ;;  %v246_v55 = vld [vmem:[#allocation4 + $0x18] sm:$0xff] }
  0x32   :  { %513 = vmatprep.subr.bf16.mxu0 %v635_v0  ;;  %v553_v54 = vpack.c.bf16 %v244_v52, %v243_v51  ;;  %v556_v56 = vpack.c.bf16 %v246_v55, %v245_v53  ;;  %v247_v57 = vld [vmem:[#allocation4 + $0x20] sm:$0xff]  ;;  %v248_v58 = vld [vmem:[#allocation4 + $0x28] sm:$0xff]  ;;  %v249_v60 = vld [vmem:[#allocation4 + $0x30] sm:$0xff] }
  0x33   :  { %536 = vmatpush3.bf16.msra.mxu1 %v535_v24  ;;  %v559_v59 = vpack.c.bf16 %v248_v58, %v247_v57  ;;  %v250_v61 = vld [vmem:[#allocation4 + $0x38] sm:$0xff]  ;;  %v251_v63 = vld [vmem:[#allocation4 + $0x40] sm:$0xff]  ;;  %v253_v3 = vld [vmem:[#allocation4 + $0x50] sm:$0xff] }
  0x34   :  { %537 = vmatprep.subr.bf16.mxu1 %v635_v0  ;;  %v562_v62 = vpack.c.bf16 %v250_v61, %v249_v60  ;;  %v254_v4 = vld [vmem:[#allocation4 + $0x58] sm:$0xff]  ;;  %v255_v6 = vld [vmem:[#allocation4 + $0x60] sm:$0xff]  ;;  %v256_v7 = vld [vmem:[#allocation4 + $0x68] sm:$0xff] }
  0x35   :  { %515 = vmatpush3.bf16.msra.mxu0 %v514_v21  ;;  %v568_v5 = vpack.c.bf16 %v254_v4, %v253_v3  ;;  %v571_v8 = vpack.c.bf16 %v256_v7, %v255_v6  ;;  %v345_v9 = vld [vmem:[%s801_s2] ss:$0 sm:$0xff]  ;;  %v257_v14 = vld [vmem:[#allocation4 + $0x70] sm:$0xff]  ;;  %v258_v15 = vld [vmem:[#allocation4 + $0x78] sm:$0xff] }
  0x36   :  { %516 = vmatprep.subr.bf16.mxu0 %v635_v0  ;;  %v574_v16 = vpack.c.bf16 %v258_v15, %v257_v14  ;;  %v346_v17 = vld [vmem:[%s803_s4] ss:$0 sm:$0xff] }
  0x37   :  { %539 = vmatpush3.bf16.msra.mxu1 %v538_v30  ;;  %v347_v21 = vld [vmem:[%s805_s6] ss:$0 sm:$0xff] }
  0x38   :  { %540 = vmatprep.subr.bf16.mxu1 %v635_v0 }
  0x39   :  { %518 = vmatpush3.bf16.msra.mxu0 %v517_v27 }
  0x3a   :  { %519 = vmatprep.subr.bf16.mxu0 %v635_v0 }
  0x3b   :  { %542 = vmatpush3.bf16.msra.mxu1 %v541_v36 }
  0x3c   :  { %543 = vmatprep.subr.bf16.mxu1 %v635_v0 }
  0x3d   :  { %521 = vmatpush3.bf16.msra.mxu0 %v520_v33 }
  0x3e   :  { %522 = vmatprep.subr.bf16.mxu0 %v635_v0 }
  0x3f   :  { %545 = vmatpush3.bf16.msra.mxu1 %v544_v42 }
  0x40   :  { %546 = vmatprep.subr.bf16.mxu1 %v635_v0 }
  0x41   :  { %524 = vmatpush3.bf16.msra.mxu0 %v523_v39 }
  0x42   :  { %525 = vmatprep.subr.bf16.mxu0 %v635_v0 }
  0x43   :  { %548 = vmatpush3.bf16.msra.mxu1 %v547_v46 }
  0x44   :  { %549 = vmatprep.subr.bf16.mxu1 %v635_v0 }
  0x45   :  { %527 = vmatpush3.bf16.msra.mxu0 %v526_v45 }
  0x46   :  { %552 = vmatprep.subr.bf16.mxu0 %v635_v0 }
  0x47   :  { %551 = vmatpush3.bf16.msra.mxu1 %v550_v50 }
  0x48   :  { %432 = vmatmul.mubr.f32.vlgmr.msra.gmra.mrb[0].mxu0 %v772_v47 }
  0x49   :  { %501 = vmatprep.mubr.msk.f32.mxu0 %vm636_vm0, %v637_v1  ;;  %554 = vmatpush3.bf16.msra.mxu0 %v553_v54  ;;  %v252_v1 = vld [vmem:[#allocation4 + $0x48] sm:$0xff] }
  0x4a   :  { %555 = vmatprep.subr.bf16.mxu0 %v635_v0  ;;  %v565_v2 = vpack.c.bf16 %v252_v1, %v251_v63 }
  0x4d   :  { %557 = vmatpush3.bf16.msra.mxu0 %v556_v56 }
  0x4e   :  { %558 = vmatprep.subr.bf16.mxu0 %v635_v0 }
  0x51   :  { %560 = vmatpush3.bf16.msra.mxu0 %v559_v59 }
  0x52   :  { %561 = vmatprep.subr.bf16.mxu0 %v635_v0 }
  0x55   :  { %563 = vmatpush3.bf16.msra.mxu0 %v562_v62 }
  0x56   :  { %564 = vmatprep.subr.bf16.mxu0 %v635_v0 }
  0x59   :  { %566 = vmatpush3.bf16.msra.mxu0 %v565_v2 }
  0x5a   :  { %567 = vmatprep.subr.bf16.mxu0 %v635_v0 }
  0x5d   :  { %569 = vmatpush3.bf16.msra.mxu0 %v568_v5 }
  0x5e   :  { %570 = vmatprep.subr.bf16.mxu0 %v635_v0 }
  0x61   :  { %572 = vmatpush3.bf16.msra.mxu0 %v571_v8 }
  0x62   :  { %573 = vmatprep.subr.bf16.mxu0 %v635_v0 }
  0x65   :  { %575 = vmatpush3.bf16.msra.mxu0 %v574_v16 }
 0x11b   :  { %v144_v10 = vpop.f32.mrb[0].mxu0 }
 0x11c   :  { %v145_v11 = vadd.f32 %v345_v9, %v144_v10  ;;  %v433_v12 = vpop.f32.mrb[1].mxu0 }
 0x11e   :  { %v148_v13 = vmax.f32 %v145_v11, 0.0 }
 0x120   :  { %467 = vmatmul.mubr.f32.vlgmr.msra.gmra.mrb[0].mxu1 %v148_v13 }
 0x1f3   :  { %v238_v18 = vpop.f32.mrb[0].mxu1 }
 0x1f4   :  { %v239_v19 = vadd.f32 %v346_v17, %v238_v18  ;;  %v468_v0 = vpop.f32.mrb[1].mxu1 }
 0x1f6   :  { %v242_v20 = vmax.f32 %v239_v19, 0.0 }
 0x1f8   :  { %502 = vmatmul.mubr.f32.vlgmr.msra.gmra.mrb[2].mxu0 %v242_v20 }
 0x2cb   :  { %v332_v22 = vpop.f32.mrb[2].mxu0 }
 0x2cc   :  { %v333_v23 = vadd.f32 %v347_v21, %v332_v22  ;;  %v503_v24 = vpop.f32.mrb[3].mxu0 }
 0x2ce   :  { %v336_v25 = vadd.f32 %v333_v23, %v772_v47 }
 0x2d0   :  { %v337_v26 = vmax.f32 %v336_v25, 0.0 }
 0x2d2   :  { %338 = vst [vmem:[%s806_s7] sm:$0xff] %v337_v26 }
 0x2d3   :  { %343 = vsyncpa [#allocation3], 1 }
 0x2d4   :  { %344 = vsyncpa [#allocation5], 1 }

</bundles_post_ra>
